<compile_context>
chip_gen: v6e
topology: v6e:2x2x1
jax: 0.10.0
libtpu: 0.0.40
codegen_flags: <defaults>
</compile_context>

<pallas_src>
import jax
import jax.numpy as jnp
from jax import lax
from jax.experimental import pallas as pl
from jax.experimental.pallas import tpu as pltpu

_CLIP_MEAN = (0.48145466, 0.4578275, 0.40821073)
_CLIP_STD = (0.26862954, 0.26130258, 0.27577711)

_ROW_TILE_TARGET = 64      # multiple of 32 -> safe sublane packing for uint8
_LANE_TILE_TARGET = 8192   # multiple of 128 -> lane-dense, unmasked stores


def _pick_tile(extent: int, target: int, multiple: int) -> int:
    """Largest tile <= target that is a multiple of `multiple`, or full extent."""
    if extent <= target:
        return extent            # full extent is always a legal block dim
    return max((target // multiple) * multiple, multiple)


def _make_normalize_kernel(scale, offset):
    num_channels = len(scale)

    def kernel(x_ref, o_ref):
        tr = x_ref.shape[0]
        # Reconstruct each row's channel: global row = i * TR + r, ch = row % C.
        row0 = pl.program_id(0) * tr
        ch = (row0 + lax.broadcasted_iota(jnp.int32, (tr, 1), 0)) % num_channels
        s = jnp.full((tr, 1), scale[0], dtype=jnp.float32)
        b = jnp.full((tr, 1), offset[0], dtype=jnp.float32)
        for c in range(1, num_channels):
            s = jnp.where(ch == c, scale[c], s)
            b = jnp.where(ch == c, offset[c], b)
        # Convert raw pixels (uint8 or float) to f32 in-VMEM, apply the fused
        # affine, and cast to the output dtype only at the store.
        x = x_ref[...].astype(jnp.float32)
        o_ref[...] = (x * s + b).astype(o_ref.dtype)

    return kernel


def normalize_image(image, out_dtype=jnp.float32):
    n, c, h, w = image.shape
    assert c == len(_CLIP_MEAN), "normalization constants are defined for 3 channels"

    scale = tuple(1.0 / (255.0 * s) for s in _CLIP_STD)
    offset = tuple(-m / s for m, s in zip(_CLIP_MEAN, _CLIP_STD))

    nc, hw = n * c, h * w
    x2d = image.reshape(nc, hw)   # free reshape; keep source dtype (no f32 HBM copy)

    tr = _pick_tile(nc, _ROW_TILE_TARGET, 32)
    tc = _pick_tile(hw, _LANE_TILE_TARGET, 128)
    grid = (pl.cdiv(nc, tr), pl.cdiv(hw, tc))

    out2d = pl.pallas_call(
        _make_normalize_kernel(scale, offset),
        out_shape=jax.ShapeDtypeStruct((nc, hw), out_dtype),
        grid=grid,
        in_specs=[pl.BlockSpec((tr, tc), lambda i, j: (i, j))],
        out_specs=pl.BlockSpec((tr, tc), lambda i, j: (i, j)),
        compiler_params=pltpu.CompilerParams(
            dimension_semantics=("parallel", "parallel"),
            vmem_limit_bytes=32 * 1024 * 1024,
        ),
    )(x2d)
    return out2d.reshape(n, c, h, w)


def gpu_data_processing(batch, mixup_alpha: float = 0.0, out_dtype=jnp.float32):
    """JAX/Pallas port of GPUDataProcessing.forward."""
    assert mixup_alpha == 0.0, "SWMixUp (mixup_alpha > 0) is not implemented"
    if "image" not in batch:
        return batch
    new_batch = dict(batch)
    new_batch["image"] = normalize_image(batch["image"], out_dtype=out_dtype)
    return new_batch


if __name__ == "__main__":
    key = jax.random.PRNGKey(0)
    k0, k1, k2 = jax.random.split(key, 3)

    mean = jnp.array(_CLIP_MEAN, jnp.float32).reshape(1, 3, 1, 1)
    std = jnp.array(_CLIP_STD, jnp.float32).reshape(1, 3, 1, 1)

    def reference(img_f32):
        return (img_f32 / 255.0 - mean) / std

    # 1) uint8 input (typical raw pixels), f32 output — single-tile path.
    img_u8 = jax.random.randint(k0, (2, 3, 16, 16), 0, 256, dtype=jnp.int32).astype(jnp.uint8)
    out = jax.block_until_ready(gpu_data_processing({"image": img_u8})["image"])
    ref = reference(img_u8.astype(jnp.float32))
    assert out.shape == (2, 3, 16, 16) and out.dtype == jnp.float32
    assert jnp.allclose(out, ref, atol=1e-5, rtol=1e-5), "uint8 path mismatch"

    # 1b) bf16 output (halves the write stream for bf16 consumers).
    out_bf16 = jax.block_until_ready(
        gpu_data_processing({"image": img_u8}, out_dtype=jnp.bfloat16)["image"])
    assert out_bf16.dtype == jnp.bfloat16
    assert jnp.allclose(out_bf16.astype(jnp.float32), ref, atol=3e-2, rtol=3e-2), \
        "bf16 output mismatch"

    # 2) uint8 input spanning several row tiles (NC = 192 -> 3 row tiles of 64):
    #    checks the per-tile channel reconstruction across tile boundaries.
    img2 = jax.random.randint(k1, (64, 3, 32, 32), 0, 256, dtype=jnp.int32).astype(jnp.uint8)
    out2 = jax.block_until_ready(gpu_data_processing({"image": img2})["image"])
    ref2 = reference(img2.astype(jnp.float32))
    assert jnp.allclose(out2, ref2, atol=1e-5, rtol=1e-5), "multi-row-tile mismatch"

    # 3) float32 input spanning several lane tiles (HW = 16384 -> 2 tiles of 8192).
    img3 = jax.random.uniform(k2, (2, 3, 128, 128), jnp.float32, 0.0, 255.0)
    out3 = jax.block_until_ready(gpu_data_processing({"image": img3})["image"])
    ref3 = reference(img3)
    assert jnp.allclose(out3, ref3, atol=1e-5, rtol=1e-5), "multi-lane-tile mismatch"

    # Pass-through when there is no image key (matches reference forward).
    passthrough = gpu_data_processing({"label": jnp.zeros((2,), jnp.int32)})
    assert "image" not in passthrough

    print("KERNEL_OK")
</pallas_src>

<mosaic_0001>
module attributes {stable_mosaic.version = 11 : i64} {
  func.func @kernel(%arg0: i32, %arg1: i32, %arg2: memref<6x256xi8, #tpu.memory_space<vmem>>, %arg3: memref<6x256xf32, #tpu.memory_space<vmem>>) attributes {dimension_semantics = [#tpu.dimension_semantics<parallel>, #tpu.dimension_semantics<parallel>], iteration_bounds = array<i64: 1, 1>, scalar_prefetch = 0 : i64, scratch_operands = 0 : i64, tpu.core_type = #tpu.core_type<tc>, window_params = [{transform_indices = @transform_0, window_bounds = array<i64: 6, 256>}, {transform_indices = @transform_1, window_bounds = array<i64: 6, 256>}]} {
    %c6_i32 = arith.constant 6 : i32
    %0 = arith.muli %arg0, %c6_i32 : i32
    %1 = tpu.iota {dimensions = array<i32: 0>} : vector<6x1xi32>
    %2 = vector.broadcast %0 : i32 to vector<6x1xi32>
    %3 = arith.addi %2, %1 : vector<6x1xi32>
    %c3_i32 = arith.constant 3 : i32
    %c0_i32 = arith.constant 0 : i32
    %4 = arith.cmpi eq, %c3_i32, %c0_i32 : i32
    %c1_i32 = arith.constant 1 : i32
    %5 = arith.select %4, %c1_i32, %c3_i32 : i32
    %6 = vector.broadcast %5 : i32 to vector<6x1xi32>
    %7 = arith.remsi %3, %6 : vector<6x1xi32>
    %c0_i32_0 = arith.constant 0 : i32
    %8 = vector.broadcast %c0_i32_0 : i32 to vector<6x1xi32>
    %9 = arith.cmpi ne, %7, %8 : vector<6x1xi32>
    %c0_i32_1 = arith.constant 0 : i32
    %10 = vector.broadcast %c0_i32_1 : i32 to vector<6x1xi32>
    %11 = arith.cmpi slt, %7, %10 : vector<6x1xi32>
    %c0_i32_2 = arith.constant 0 : i32
    %12 = arith.cmpi slt, %5, %c0_i32_2 : i32
    %13 = vector.broadcast %12 : i1 to vector<6x1xi1>
    %14 = vector.broadcast %13 : vector<6x1xi1> to vector<6x1xi1>
    %15 = arith.xori %11, %14 : vector<6x1xi1>
    %16 = arith.andi %15, %9 : vector<6x1xi1>
    %17 = vector.broadcast %5 : i32 to vector<6x1xi32>
    %18 = arith.addi %7, %17 : vector<6x1xi32>
    %19 = arith.select %16, %18, %7 : vector<6x1xi1>, vector<6x1xi32>
    %cst = arith.constant 0.0145984264 : f32
    %20 = vector.broadcast %cst : f32 to vector<6x1xf32>
    %cst_3 = arith.constant -1.79226255 : f32
    %21 = vector.broadcast %cst_3 : f32 to vector<6x1xf32>
    %c1_i32_4 = arith.constant 1 : i32
    %22 = vector.broadcast %c1_i32_4 : i32 to vector<6x1xi32>
    %23 = arith.cmpi eq, %19, %22 : vector<6x1xi32>
    %cst_5 = arith.constant 0.0150077688 : f32
    %24 = vector.broadcast %cst_5 : f32 to vector<6x1xf32>
    %25 = arith.select %23, %24, %20 : vector<6x1xi1>, vector<6x1xf32>
    %c1_i32_6 = arith.constant 1 : i32
    %26 = vector.broadcast %c1_i32_6 : i32 to vector<6x1xi32>
    %27 = arith.cmpi eq, %19, %26 : vector<6x1xi32>
    %cst_7 = arith.constant -1.75209713 : f32
    %28 = vector.broadcast %cst_7 : f32 to vector<6x1xf32>
    %29 = arith.select %27, %28, %21 : vector<6x1xi1>, vector<6x1xf32>
    %c2_i32 = arith.constant 2 : i32
    %30 = vector.broadcast %c2_i32 : i32 to vector<6x1xi32>
    %31 = arith.cmpi eq, %19, %30 : vector<6x1xi32>
    %cst_8 = arith.constant 0.0142200654 : f32
    %32 = vector.broadcast %cst_8 : f32 to vector<6x1xf32>
    %33 = arith.select %31, %32, %25 : vector<6x1xi1>, vector<6x1xf32>
    %c2_i32_9 = arith.constant 2 : i32
    %34 = vector.broadcast %c2_i32_9 : i32 to vector<6x1xi32>
    %35 = arith.cmpi eq, %19, %34 : vector<6x1xi32>
    %cst_10 = arith.constant -1.48021972 : f32
    %36 = vector.broadcast %cst_10 : f32 to vector<6x1xf32>
    %37 = arith.select %35, %36, %29 : vector<6x1xi1>, vector<6x1xf32>
    %c0 = arith.constant 0 : index
    %c0_11 = arith.constant 0 : index
    %38 = vector.load %arg2[%c0, %c0_11] : memref<6x256xi8, #tpu.memory_space<vmem>>, vector<6x256xi8>
    %39 = arith.uitofp %38 : vector<6x256xi8> to vector<6x256xf32>
    %40 = vector.broadcast %33 : vector<6x1xf32> to vector<6x256xf32>
    %41 = arith.mulf %39, %40 : vector<6x256xf32>
    %42 = vector.broadcast %37 : vector<6x1xf32> to vector<6x256xf32>
    %43 = arith.addf %41, %42 : vector<6x256xf32>
    %c0_12 = arith.constant 0 : index
    %c0_13 = arith.constant 0 : index
    %44 = vector.load %arg3[%c0_12, %c0_13] : memref<6x256xf32, #tpu.memory_space<vmem>>, vector<6x256xf32>
    tpu.vector_store %arg3[%c0_12, %c0_13], %43 {strides = array<i32>} : memref<6x256xf32, #tpu.memory_space<vmem>>, vector<6x256xf32>,
    return
  }
  func.func @transform_0(%arg0: i32, %arg1: i32) -> (i32, i32) {
    %c0_i32 = arith.constant 0 : i32
    return %arg0, %arg1 : i32, i32
  }
  func.func @transform_1(%arg0: i32, %arg1: i32) -> (i32, i32) {
    %c0_i32 = arith.constant 0 : i32
    return %arg0, %arg1 : i32, i32
  }
}

</mosaic_0001>

<bundles_post_ra>
// kernel: tpu_custom_call.1
= control target key start
LH: loop header
LB: loop body
LE: loop exit
PB: predicated region body
PF: predicated region fallthrough
CT: control target
= control target key end

     0   :  { %6 = vsyncpa [#allocation3], 0  ;;  %s150_s0 = inlined_call_operand.hbm [shape: u8[6,256], index: 0, kind: input, shape index: {}]   ;;  %s151_s1 = inlined_call_operand.hbm [shape: f32[6,256], index: 1, kind: output, shape index: {}]  }
   0x1   :  { %7 = vsyncpa [#allocation4], 0  ;;  %s126_s6 = smov [#allocation2]  }
   0x2   :  { %s14_s7 = sshll.u32 %s126_s6, 4  ;;  %s15_s7 = int_to_ptr.vmem [resolvable:$true] %s14_s7 }
   0x3   :  { %s90_s8 = scalar_lea.vmem %s15_s7, 64  ;;  %p95_p1 = scmp.lt.s32.totalorder %s15_s7, %s15_s7 }
   0x4   :  { %p91_p0 = scmp.ne.s32.totalorder %s15_s7, %s90_s8  ;;  %p96_p2 = scmp.lt.s32.totalorder %s90_s8, %s90_s8 }
   0x6   :  { %p97_p3 = por %p96_p2, %p95_p1 }
   0x8   :  { %p98_p4 = pnand %p97_p3, %p91_p0 }
   0xa   :  { %101 = shalt.err (!%p98_p4)
}
   0xb   :  { %17 = dma.hbm_to_vmem [thread:$0]  %s150_s0, 64, %s15_s7, [#allocation3]  }
   0xc   :  { %122 = dma.done.wait [#allocation3], 64  }
   0xd   :  { %123 = vsyncadd [#allocation3], 4294967232  ;;  %v22_v0 = vlaneseq  ;;  %v48_v4 = vld [vmem:[#allocation2] sm:$0xf]  ;;  %v127_v16 = vmov 0.014598426  }
   0xe   :  { %v49_v6 = vunpack.c.0.s8 %v48_v4  ;;  %v50_v7 = vunpack.c.1.s8 %v48_v4  ;;  %v128_v18 = vmov -1.7922626   ;;  %s129_s0 = smov [#allocation5]  }
   0xf   :  { %v23_v1 = vshrl.u32 %v22_v0, 7  ;;  %s67_s11 = sshll.u32 %s129_s0, 4  ;;  %s68_s11 = int_to_ptr.vmem [resolvable:$true] %s67_s11 }
  0x10   :  { %v51_v10 = vand.u32 255, %v49_v6  ;;  %v52_v11 = vand.u32 255, %v50_v7  ;;  %s102_s12 = scalar_lea.vmem %s68_s11, 256  ;;  %p107_p6 = scmp.lt.s32.totalorder %s68_s11, %s68_s11 }
  0x11   :  { %v143_v2 = vmul.u32.u64.low 2863311531, %v23_v1  ;;  %v144_v3 = vmul.u32.u64.high 2863311531, %v23_v1, %v143_v2  ;;  %p103_p5 = scmp.ne.s32.totalorder %s68_s11, %s102_s12  ;;  %p108_p7 = scmp.lt.s32.totalorder %s102_s12, %s102_s12 }
  0x12   :  { %v53_v14 = vcvt.s32.f32 %v51_v10  ;;  %v54_v15 = vcvt.s32.f32 %v52_v11 }
  0x13   :  { %v32_v5 = vshrl.u32 %v144_v3, 1  ;;  %p109_p8 = por %p108_p7, %p107_p6 }
  0x15   :  { %v33_v8 = vmul.u32 3, %v32_v5  ;;  %p110_p9 = pnand %p109_p8, %p103_p5 }
  0x17   :  { %v34_v9 = vsub.s32 %v23_v1, %v33_v8 }
  0x19   :  { %vm37_vm0 = vcmp.ne.s32.totalorder %v34_v9, 0  ;;  %vm38_vm1 = vcmp.lt.s32.totalorder %v34_v9, 0  ;;  %v40_v12 = vadd.s32 3, %v34_v9 }
  0x1a   :  { %vm39_vm2 = vmand %vm38_vm1, %vm37_vm0 }
  0x1b   :  { %v41_v13 = vsel %vm39_vm2, %v40_v12, %v34_v9 }
  0x1c   :  { %vm42_vm3 = vcmp.eq.s32.totalorder %v41_v13, 1  ;;  %vm45_vm4 = vcmp.eq.s32.totalorder %v41_v13, 2 }
  0x1d   :  { %v43_v17 = vsel %vm42_vm3, 0.015007769, %v127_v16  ;;  %v44_v19 = vsel %vm42_vm3, -1.7520971, %v128_v18 }
  0x1e   :  { %v46_v20 = vsel %vm45_vm4, 0.014220065, %v43_v17  ;;  %v47_v21 = vsel %vm45_vm4, -1.4802197, %v44_v19 }
  0x1f   :  { %v55_v22 = vmul.f32 %v53_v14, %v46_v20  ;;  %v56_v23 = vmul.f32 %v54_v15, %v46_v20 }
  0x21   :  { %v57_v24 = vadd.f32 %v55_v22, %v47_v21  ;;  %v58_v25 = vadd.f32 %v56_v23, %v47_v21 }
  0x23   :  { %59 = vst [vmem:[#allocation5] sm:$0x3f] %v57_v24  ;;  %60 = vst [vmem:[#allocation5 + $0x8] sm:$0x3f] %v58_v25 }
  0x24   :  { %113 = shalt.err (!%p110_p9)
}
  0x25   :  { %70 = dma.vmem_to_hbm [thread:$0]  %s68_s11, 256, %s151_s1, [#allocation4]  }
  0x26   :  { %124 = dma.done.wait [#allocation4], 256  }
  0x27   :  { %125 = vsyncadd [#allocation4], 4294967040 }
  0x28   :  { %74 = vsyncpa [#allocation3], 1 }
  0x29   :  { %75 = vsyncpa [#allocation4], 1 }

</bundles_post_ra>
